<compile_context>
chip_gen: v6e
topology: v6e:2x2x1
jax: 0.10.0
libtpu: 0.0.40
codegen_flags: <defaults>
</compile_context>

<pallas_src>
import functools

import jax
import jax.numpy as jnp
from jax.experimental import pallas as pl
from jax.experimental.pallas import tpu as pltpu


def _round_up(x, m):
    return ((x + m - 1) // m) * m


def _vmem_capacity_bytes():
    """Per-core VMEM capacity; conservative fallback (v7x = 64 MiB/TC)."""
    try:
        info = pltpu.get_tpu_info()
        cap = int(getattr(info, "vmem_capacity_bytes", 0) or 0)
        if cap > 0:
            return cap
    except Exception:
        pass
    return 64 * 2**20


def _choose_tm(M, per_row_bytes, fixed_bytes, usable_bytes, tm_max):
    """Largest 16-aligned row tile that fits the VMEM budget, then split the
    batch into equal-ish tiles to avoid up-to-(tm-1) rows of padding waste."""
    row_align = 16  # bf16 packed tile is (16, 128); 16 is also fine for f32
    budget = max(usable_bytes - fixed_bytes, row_align * per_row_bytes)
    tm_cap = (budget // max(per_row_bytes, 1)) // row_align * row_align
    tm_cap = max(row_align, min(int(tm_max), int(tm_cap)))
    nt = -(-M // tm_cap)                        # number of row tiles
    tm = _round_up(-(-M // nt), row_align)      # equal-ish tile size
    return int(tm), int(nt * tm)


# -----------------------------------------------------------------------------
# Kernel A: all hidden-layer weights resident in VMEM, 1-D row grid.
# -----------------------------------------------------------------------------
def _mlp_resident_kernel(*refs, num_hidden, relu_last):
    if num_hidden > 0:
        x_ref, wh_ref, bh_ref, wl_ref, bl_ref, o_ref = refs
    else:
        x_ref, wl_ref, bl_ref, o_ref = refs
        wh_ref = bh_ref = None

    h = x_ref[...].astype(jnp.float32)
    for li in range(num_hidden):                       # static -> fully unrolled
        acc = jnp.dot(h.astype(wh_ref.dtype), wh_ref[li],
                      preferred_element_type=jnp.float32)   # MXU, f32 accum
        acc = acc + bh_ref[li]                                # (tm,Dp)+(1,Dp)
        h = jnp.maximum(acc, 0.0)

    out = jnp.dot(h.astype(wl_ref.dtype), wl_ref[...],
                  preferred_element_type=jnp.float32)
    out = out + bl_ref[...]
    if relu_last:
        out = jnp.maximum(out, 0.0)
    o_ref[...] = out.astype(o_ref.dtype)


# -----------------------------------------------------------------------------
# Kernel B: hidden-layer weights streamed over an "arbitrary" grid axis,
# activation carried across layer steps in a VMEM scratch.
# -----------------------------------------------------------------------------
def _mlp_streamed_kernel(x_ref, wh_ref, bh_ref, wl_ref, bl_ref, o_ref, h_ref,
                         *, relu_last):
    l = pl.program_id(1)

    @pl.when(l == 0)
    def _():
        h_ref[...] = x_ref[...].astype(jnp.float32)

    acc = jnp.dot(h_ref[...].astype(wh_ref.dtype), wh_ref[0],
                  preferred_element_type=jnp.float32)
    acc = acc + bh_ref[0]
    h_ref[...] = jnp.maximum(acc, 0.0)

    @pl.when(l == pl.num_programs(1) - 1)
    def _():
        out = jnp.dot(h_ref[...].astype(wl_ref.dtype), wl_ref[...],
                      preferred_element_type=jnp.float32)
        out = out + bl_ref[...]
        if relu_last:
            out = jnp.maximum(out, 0.0)
        o_ref[...] = out.astype(o_ref.dtype)


# -----------------------------------------------------------------------------
# Parameter preparation (one-time, outside the hot path).
# -----------------------------------------------------------------------------
def prepare_mlp_params(params, inp_dim, out_dim, compute_dtype=jnp.bfloat16):
    """Pre-transpose to (in,out), zero-pad feature dims to multiples of 128,
    stack the hidden layers, and keep the (possibly narrower) last layer
    separate.  bf16 weights by default (f32 accumulation stays in-kernel).

    params: list of (w (d_out, d_in), b (d_out,)) in nn.Linear layout.
    Returns (w_hidden (L-1,Dp,Dp)|None, b_hidden (L-1,1,Dp)|None,
             w_last (Dp,Dp_out), b_last (1,Dp_out)).
    """
    Dp = _round_up(inp_dim, 128)
    Dp_out = _round_up(out_dim, 128)
    *hidden, (w_last, b_last) = params

    wh_list, bh_list = [], []
    for (w, b) in hidden:
        wt = jnp.zeros((Dp, Dp), compute_dtype).at[:inp_dim, :inp_dim].set(
            jnp.asarray(w).T.astype(compute_dtype))
        bp = jnp.zeros((1, Dp), jnp.float32).at[0, :inp_dim].set(
            jnp.asarray(b, jnp.float32))
        wh_list.append(wt)
        bh_list.append(bp)

    w_hidden = jnp.stack(wh_list) if wh_list else None
    b_hidden = jnp.stack(bh_list) if bh_list else None
    wl = jnp.zeros((Dp, Dp_out), compute_dtype).at[:inp_dim, :out_dim].set(
        jnp.asarray(w_last).T.astype(compute_dtype))
    bl = jnp.zeros((1, Dp_out), jnp.float32).at[0, :out_dim].set(
        jnp.asarray(b_last, jnp.float32))
    return w_hidden, b_hidden, wl, bl


# -----------------------------------------------------------------------------
# Forward pass: one fused pallas_call for the whole MLP.
# -----------------------------------------------------------------------------
@functools.partial(jax.jit,
                   static_argnames=("out_dim", "relu", "tm_max", "stream_weights"))
def mlp_forward(x, w_hidden, b_hidden, w_last, b_last, *,
                out_dim, relu=True, tm_max=None, stream_weights=None):
    M, K = x.shape
    Dp, Dp_out = w_last.shape
    num_hidden = 0 if w_hidden is None else w_hidden.shape[0]

    w_item = jnp.dtype(w_last.dtype).itemsize
    x_item = jnp.dtype(x.dtype).itemsize
    out_dtype = x.dtype
    out_item = jnp.dtype(out_dtype).itemsize

    if tm_max is None:
        tm_max = 1024 if Dp <= 1024 else 512

    cap = _vmem_capacity_bytes()
    usable = cap - (8 << 20)                      # headroom below physical VMEM

    # Resident hidden weights are double-buffered by the pipeline (constant
    # index_map -> DMA'd once, but two buffers allocated).  Stream them layer
    # by layer when that footprint would eat more than ~half the budget.
    resident_w_bytes = 2 * (num_hidden * Dp * Dp + Dp * Dp_out) * w_item
    if stream_weights is None:
        stream = (num_hidden > 0) and (resident_w_bytes > usable // 2)
    else:
        stream = bool(stream_weights) and (num_hidden > 0)

    # VMEM `need` model: weights/biases + double-buffered in/out tiles +
    # in-kernel f32 temporaries (h / acc), per row of the tile.
    if stream:
        fixed = (2 * (Dp * Dp + Dp * Dp_out) * w_item
                 + 2 * (Dp + Dp_out) * 4)
    else:
        fixed = resident_w_bytes + 2 * (num_hidden * Dp + Dp_out) * 4
    per_row = 2 * Dp * x_item + 2 * Dp_out * out_item + (2 * Dp + Dp_out) * 4

    tm, M_pad = _choose_tm(M, per_row, fixed, usable, tm_max)
    need = fixed + tm * per_row
    vmem_limit = int(min(usable, max(need + (4 << 20), 32 << 20)))

    # Pad activations only when needed (padded weight rows/cols & biases are 0,
    # so padded feature columns stay exactly 0 through every layer).
    if (M_pad, Dp) == (M, K):
        x_in = x
    else:
        x_in = jnp.pad(x, ((0, M_pad - M), (0, Dp - K)))

    out_sds = jax.ShapeDtypeStruct((M_pad, Dp_out), out_dtype)

    if stream:
        kernel = functools.partial(_mlp_streamed_kernel, relu_last=relu)
        out_pad = pl.pallas_call(
            kernel,
            out_shape=out_sds,
            grid_spec=pltpu.PrefetchScalarGridSpec(
                num_scalar_prefetch=0,
                grid=(M_pad // tm, num_hidden),
                in_specs=[
                    pl.BlockSpec((tm, Dp), lambda i, l: (i, 0)),
                    pl.BlockSpec((1, Dp, Dp), lambda i, l: (l, 0, 0)),   # streamed
                    pl.BlockSpec((1, 1, Dp), lambda i, l: (l, 0, 0)),
                    pl.BlockSpec((Dp, Dp_out), lambda i, l: (0, 0)),     # resident
                    pl.BlockSpec((1, Dp_out), lambda i, l: (0, 0)),
                ],
                out_specs=pl.BlockSpec((tm, Dp_out), lambda i, l: (i, 0)),
                scratch_shapes=[pltpu.VMEM((tm, Dp), jnp.float32)],      # carried h
            ),
            compiler_params=pltpu.CompilerParams(
                dimension_semantics=("parallel", "arbitrary"),
                vmem_limit_bytes=vmem_limit,
            ),
        )(x_in, w_hidden, b_hidden, w_last, b_last)
    else:
        kernel = functools.partial(_mlp_resident_kernel,
                                   num_hidden=num_hidden, relu_last=relu)
        if num_hidden > 0:
            in_specs = [
                pl.BlockSpec((tm, Dp), lambda i: (i, 0)),
                pl.BlockSpec((num_hidden, Dp, Dp), lambda i: (0, 0, 0)),
                pl.BlockSpec((num_hidden, 1, Dp), lambda i: (0, 0, 0)),
                pl.BlockSpec((Dp, Dp_out), lambda i: (0, 0)),
                pl.BlockSpec((1, Dp_out), lambda i: (0, 0)),
            ]
            args = (x_in, w_hidden, b_hidden, w_last, b_last)
        else:
            in_specs = [
                pl.BlockSpec((tm, Dp), lambda i: (i, 0)),
                pl.BlockSpec((Dp, Dp_out), lambda i: (0, 0)),
                pl.BlockSpec((1, Dp_out), lambda i: (0, 0)),
            ]
            args = (x_in, w_last, b_last)
        out_pad = pl.pallas_call(
            kernel,
            out_shape=out_sds,
            grid_spec=pltpu.PrefetchScalarGridSpec(
                num_scalar_prefetch=0,
                grid=(M_pad // tm,),
                in_specs=in_specs,
                out_specs=pl.BlockSpec((tm, Dp_out), lambda i: (i, 0)),
            ),
            compiler_params=pltpu.CompilerParams(
                dimension_semantics=("parallel",),
                vmem_limit_bytes=vmem_limit,
            ),
        )(*args)

    return out_pad[:M, :out_dim]


# -----------------------------------------------------------------------------
# Init + pure-JAX reference.
# -----------------------------------------------------------------------------
def init_mlp_params(key, inp_dim, out_dim, num_layers=1, bias=True):
    """Deterministic PyTorch-style init: U(-1/sqrt(fan_in), 1/sqrt(fan_in))."""
    params = []
    dims = [(inp_dim, inp_dim)] * (num_layers - 1) + [(inp_dim, out_dim)]
    for (d_in, d_out) in dims:
        key, kw, kb = jax.random.split(key, 3)
        bound = 1.0 / jnp.sqrt(jnp.float32(d_in))
        w = jax.random.uniform(kw, (d_out, d_in), jnp.float32, -bound, bound)
        if bias:
            b = jax.random.uniform(kb, (d_out,), jnp.float32, -bound, bound)
        else:
            b = jnp.zeros((d_out,), jnp.float32)
        params.append((w, b))
    return params


def mlp_reference(x, params, relu=True):
    n = len(params)
    for li, (w, b) in enumerate(params):
        x = x @ w.T + b
        if (li != n - 1) or relu:
            x = jnp.maximum(x, 0.0)
    return x


if __name__ == "__main__":
    key = jax.random.PRNGKey(0)
    batch, inp_dim, out_dim, num_layers = 8, 32, 16, 3

    key, kx, kp = jax.random.split(key, 3)
    x = jax.random.normal(kx, (batch, inp_dim), jnp.float32)
    params = init_mlp_params(kp, inp_dim, out_dim, num_layers=num_layers, bias=True)
    ref = mlp_reference(x, params, relu=True)

    # --- f32 weights: numerically faithful path (resident + forced-streamed) ---
    wh, bh, wl, bl = prepare_mlp_params(params, inp_dim, out_dim,
                                        compute_dtype=jnp.float32)
    out_res = jax.block_until_ready(
        mlp_forward(x, wh, bh, wl, bl, out_dim=out_dim, relu=True))
    out_str = jax.block_until_ready(
        mlp_forward(x, wh, bh, wl, bl, out_dim=out_dim, relu=True,
                    stream_weights=True))
    assert out_res.shape == (batch, out_dim)
    assert jnp.allclose(out_res, ref, atol=1e-4, rtol=1e-4), "resident f32 mismatch"
    assert jnp.allclose(out_str, ref, atol=1e-4, rtol=1e-4), "streamed f32 mismatch"

    # --- bf16 weights (performance default): f32 accumulation, looser check ---
    wh16, bh16, wl16, bl16 = prepare_mlp_params(params, inp_dim, out_dim)
    out16 = jax.block_until_ready(
        mlp_forward(x, wh16, bh16, wl16, bl16, out_dim=out_dim, relu=True))
    assert jnp.allclose(out16, ref, atol=5e-2, rtol=5e-2), "bf16 mismatch"

    # --- single layer, no final ReLU (num_layers=1, relu=False branch) ---
    params1 = init_mlp_params(jax.random.PRNGKey(1), inp_dim, out_dim,
                              num_layers=1, bias=True)
    ref1 = mlp_reference(x, params1, relu=False)
    wh1, bh1, wl1, bl1 = prepare_mlp_params(params1, inp_dim, out_dim,
                                            compute_dtype=jnp.float32)
    out1 = jax.block_until_ready(
        mlp_forward(x, wh1, bh1, wl1, bl1, out_dim=out_dim, relu=False))
    assert jnp.allclose(out1, ref1, atol=1e-4, rtol=1e-4), "single-layer mismatch"

    print("KERNEL_OK")
</pallas_src>

<mosaic_0001>
module attributes {stable_mosaic.version = 11 : i64} {
  func.func @_mlp_resident_kernel(%arg0: i32, %arg1: memref<16x128xf32, #tpu.memory_space<vmem>>, %arg2: memref<2x128x128xf32, #tpu.memory_space<vmem>>, %arg3: memref<2x1x128xf32, #tpu.memory_space<vmem>>, %arg4: memref<128x128xf32, #tpu.memory_space<vmem>>, %arg5: memref<1x128xf32, #tpu.memory_space<vmem>>, %arg6: memref<16x128xf32, #tpu.memory_space<vmem>>) attributes {dimension_semantics = [#tpu.dimension_semantics<parallel>], iteration_bounds = array<i64: 1>, scalar_prefetch = 0 : i64, scratch_operands = 0 : i64, tpu.core_type = #tpu.core_type<tc>, window_params = [{transform_indices = @transform_0, window_bounds = array<i64: 16, 128>}, {pipeline_mode = #tpu.pipeline_mode<synchronous>, transform_indices = @transform_1, window_bounds = array<i64: 2, 128, 128>}, {pipeline_mode = #tpu.pipeline_mode<synchronous>, transform_indices = @transform_2, window_bounds = array<i64: 2, 1, 128>}, {pipeline_mode = #tpu.pipeline_mode<synchronous>, transform_indices = @transform_3, window_bounds = array<i64: 128, 128>}, {pipeline_mode = #tpu.pipeline_mode<synchronous>, transform_indices = @transform_4, window_bounds = array<i64: 1, 128>}, {transform_indices = @transform_5, window_bounds = array<i64: 16, 128>}]} {
    %c0 = arith.constant 0 : index
    %c0_0 = arith.constant 0 : index
    %0 = vector.load %arg1[%c0, %c0_0] : memref<16x128xf32, #tpu.memory_space<vmem>>, vector<16x128xf32>
    %c0_1 = arith.constant 0 : index
    %c0_2 = arith.constant 0 : index
    %c0_3 = arith.constant 0 : index
    %1 = vector.load %arg2[%c0_1, %c0_2, %c0_3] : memref<2x128x128xf32, #tpu.memory_space<vmem>>, vector<1x128x128xf32>
    %2 = vector.shape_cast %1 : vector<1x128x128xf32> to vector<128x128xf32>
    %cst = arith.constant dense<0.000000e+00> : vector<16x128xf32>
    %3 = tpu.matmul %0, %2, %cst {dimension_numbers = #tpu.dot_dimension_numbers<[1], [0], [0], [1], [0, 0, 1, 1], [], []>} : vector<16x128xf32>, vector<128x128xf32>, vector<16x128xf32> -> vector<16x128xf32>
    %c0_4 = arith.constant 0 : index
    %c0_5 = arith.constant 0 : index
    %c0_6 = arith.constant 0 : index
    %4 = vector.load %arg3[%c0_4, %c0_5, %c0_6] : memref<2x1x128xf32, #tpu.memory_space<vmem>>, vector<1x1x128xf32>
    %5 = vector.shape_cast %4 : vector<1x1x128xf32> to vector<1x128xf32>
    %6 = vector.broadcast %5 : vector<1x128xf32> to vector<16x128xf32>
    %7 = arith.addf %3, %6 : vector<16x128xf32>
    %cst_7 = arith.constant 0.000000e+00 : f32
    %8 = vector.broadcast %cst_7 : f32 to vector<16x128xf32>
    %9 = arith.maximumf %7, %8 : vector<16x128xf32>
    %c1 = arith.constant 1 : index
    %c0_8 = arith.constant 0 : index
    %c0_9 = arith.constant 0 : index
    %10 = vector.load %arg2[%c1, %c0_8, %c0_9] : memref<2x128x128xf32, #tpu.memory_space<vmem>>, vector<1x128x128xf32>
    %11 = vector.shape_cast %10 : vector<1x128x128xf32> to vector<128x128xf32>
    %cst_10 = arith.constant dense<0.000000e+00> : vector<16x128xf32>
    %12 = tpu.matmul %9, %11, %cst_10 {dimension_numbers = #tpu.dot_dimension_numbers<[1], [0], [0], [1], [0, 0, 1, 1], [], []>} : vector<16x128xf32>, vector<128x128xf32>, vector<16x128xf32> -> vector<16x128xf32>
    %c1_11 = arith.constant 1 : index
    %c0_12 = arith.constant 0 : index
    %c0_13 = arith.constant 0 : index
    %13 = vector.load %arg3[%c1_11, %c0_12, %c0_13] : memref<2x1x128xf32, #tpu.memory_space<vmem>>, vector<1x1x128xf32>
    %14 = vector.shape_cast %13 : vector<1x1x128xf32> to vector<1x128xf32>
    %15 = vector.broadcast %14 : vector<1x128xf32> to vector<16x128xf32>
    %16 = arith.addf %12, %15 : vector<16x128xf32>
    %cst_14 = arith.constant 0.000000e+00 : f32
    %17 = vector.broadcast %cst_14 : f32 to vector<16x128xf32>
    %18 = arith.maximumf %16, %17 : vector<16x128xf32>
    %c0_15 = arith.constant 0 : index
    %c0_16 = arith.constant 0 : index
    %19 = vector.load %arg4[%c0_15, %c0_16] : memref<128x128xf32, #tpu.memory_space<vmem>>, vector<128x128xf32>
    %cst_17 = arith.constant dense<0.000000e+00> : vector<16x128xf32>
    %20 = tpu.matmul %18, %19, %cst_17 {dimension_numbers = #tpu.dot_dimension_numbers<[1], [0], [0], [1], [0, 0, 1, 1], [], []>} : vector<16x128xf32>, vector<128x128xf32>, vector<16x128xf32> -> vector<16x128xf32>
    %c0_18 = arith.constant 0 : index
    %c0_19 = arith.constant 0 : index
    %21 = vector.load %arg5[%c0_18, %c0_19] : memref<1x128xf32, #tpu.memory_space<vmem>>, vector<1x128xf32>
    %22 = vector.broadcast %21 : vector<1x128xf32> to vector<16x128xf32>
    %23 = arith.addf %20, %22 : vector<16x128xf32>
    %cst_20 = arith.constant 0.000000e+00 : f32
    %24 = vector.broadcast %cst_20 : f32 to vector<16x128xf32>
    %25 = arith.maximumf %23, %24 : vector<16x128xf32>
    %c0_21 = arith.constant 0 : index
    %c0_22 = arith.constant 0 : index
    %26 = vector.load %arg6[%c0_21, %c0_22] : memref<16x128xf32, #tpu.memory_space<vmem>>, vector<16x128xf32>
    tpu.vector_store %arg6[%c0_21, %c0_22], %25 {strides = array<i32>} : memref<16x128xf32, #tpu.memory_space<vmem>>, vector<16x128xf32>,
    return
  }
  func.func @transform_0(%arg0: i32) -> (i32, i32) {
    %c0_i32 = arith.constant 0 : i32
    %c0_i32_0 = arith.constant 0 : i32
    return %arg0, %c0_i32 : i32, i32
  }
  func.func @transform_1(%arg0: i32) -> (i32, i32, i32) {
    %c0_i32 = arith.constant 0 : i32
    %c0_i32_0 = arith.constant 0 : i32
    %c0_i32_1 = arith.constant 0 : i32
    %c0_i32_2 = arith.constant 0 : i32
    return %c0_i32, %c0_i32_0, %c0_i32_1 : i32, i32, i32
  }
  func.func @transform_2(%arg0: i32) -> (i32, i32, i32) {
    %c0_i32 = arith.constant 0 : i32
    %c0_i32_0 = arith.constant 0 : i32
    %c0_i32_1 = arith.constant 0 : i32
    %c0_i32_2 = arith.constant 0 : i32
    return %c0_i32, %c0_i32_0, %c0_i32_1 : i32, i32, i32
  }
  func.func @transform_3(%arg0: i32) -> (i32, i32) {
    %c0_i32 = arith.constant 0 : i32
    %c0_i32_0 = arith.constant 0 : i32
    %c0_i32_1 = arith.constant 0 : i32
    return %c0_i32, %c0_i32_0 : i32, i32
  }
  func.func @transform_4(%arg0: i32) -> (i32, i32) {
    %c0_i32 = arith.constant 0 : i32
    %c0_i32_0 = arith.constant 0 : i32
    %c0_i32_1 = arith.constant 0 : i32
    return %c0_i32, %c0_i32_0 : i32, i32
  }
  func.func @transform_5(%arg0: i32) -> (i32, i32) {
    %c0_i32 = arith.constant 0 : i32
    %c0_i32_0 = arith.constant 0 : i32
    return %arg0, %c0_i32 : i32, i32
  }
}

</mosaic_0001>

<bundles_post_ra>
// kernel: mlp_forward.1
= control target key start
LH: loop header
LB: loop body
LE: loop exit
PB: predicated region body
PF: predicated region fallthrough
CT: control target
= control target key end

     0   :  { %10 = vsyncpa [#allocation3], 0  ;;  %s632_s0 = inlined_call_operand.vmem [shape: f32[16,128], index: 0, kind: input, shape index: {}]   ;;  %s633_s1 = inlined_call_operand.hbm [shape: f32[2,128,128], index: 1, kind: input, shape index: {}]   ;;  %s634_s2 = inlined_call_operand.vmem [shape: f32[2,1,128], index: 2, kind: input, shape index: {}]   ;;  %s635_s3 = inlined_call_operand.hbm [shape: f32[128,128], index: 3, kind: input, shape index: {}]   ;;  %s636_s4 = inlined_call_operand.vmem [shape: f32[1,128], index: 4, kind: input, shape index: {}]   ;;  %s637_s5 = inlined_call_operand.vmem [shape: f32[16,128], index: 5, kind: output, shape index: {}]  }
   0x1   :  { %11 = vsyncpa [#allocation5], 0  ;;  %s571_s18 = smov [#allocation2]  }
   0x2   :  { %s19_s19 = sshll.u32 %s571_s18, 4  ;;  %s20_s19 = int_to_ptr.vmem [resolvable:$true] %s19_s19 }
   0x3   :  { %s535_s20 = scalar_lea.vmem %s20_s19, 4096  ;;  %p540_p1 = scmp.lt.s32.totalorder %s20_s19, %s20_s19 }
   0x4   :  { %p536_p0 = scmp.ne.s32.totalorder %s20_s19, %s535_s20  ;;  %p541_p2 = scmp.lt.s32.totalorder %s535_s20, %s535_s20 }
   0x6   :  { %p542_p3 = por %p541_p2, %p540_p1 }
   0x8   :  { %p543_p4 = pnand %p542_p3, %p536_p0 }
   0xa   :  { %546 = shalt.err (!%p543_p4)
}
   0xb   :  { %s572_s21 = smov 128   ;;  %s573_s22 = smov 8  }
   0xc   :  { %25 = dma.hbm_to_vmem [thread:$0]  %s633_s1, 4096, %s20_s19, [#allocation3], %s572_s21, %s572_s21, %s573_s22  }
   0xd   :  { %s574_s25 = smov [#allocation4]  }
   0xe   :  { %s33_s26 = sshll.u32 %s574_s25, 4  ;;  %s34_s26 = int_to_ptr.vmem [resolvable:$true] %s33_s26 }
   0xf   :  { %s555_s27 = scalar_lea.vmem %s34_s26, 2048  ;;  %p560_p6 = scmp.lt.s32.totalorder %s34_s26, %s34_s26 }
  0x10   :  { %p556_p5 = scmp.ne.s32.totalorder %s34_s26, %s555_s27  ;;  %p561_p7 = scmp.lt.s32.totalorder %s555_s27, %s555_s27 }
  0x12   :  { %p562_p8 = por %p561_p7, %p560_p6 }
  0x14   :  { %p563_p9 = pnand %p562_p8, %p556_p5 }
  0x16   :  { %566 = shalt.err (!%p563_p9)
}
  0x17   :  { %39 = dma.hbm_to_vmem [thread:$0]  %s635_s3, 2048, %s34_s26, [#allocation5], %s572_s21, %s572_s21, %s573_s22  }
  0x18   :  { %567 = dma.done.wait [#allocation3], 4096  }
  0x19   :  { %568 = vsyncadd [#allocation3], 4294963200 }
  0x1a   :  { %569 = dma.done.wait [#allocation5], 2048  }
  0x1b   :  { %570 = vsyncadd [#allocation5], 4294965248  ;;  %v65_v0 = vld [vmem:[#allocation2 + $0x78] sm:$0xff]  ;;  %v64_v1 = vld [vmem:[#allocation2 + $0x70] sm:$0xff] }
  0x1c   :  { %418 = vmatprep.subr.mxu0 %v65_v0  ;;  %v63_v2 = vld [vmem:[#allocation2 + $0x68] sm:$0xff]  ;;  %v62_v3 = vld [vmem:[#allocation2 + $0x60] sm:$0xff]  ;;  %v61_v5 = vld [vmem:[#allocation2 + $0x58] sm:$0xff] }
  0x1d   :  { %419 = vmatpush3.msra.mxu0 %v65_v0  ;;  %v48_v4 = vld [vmem:[%s632_s0] sm:$0xff]  ;;  %v166_v6 = vld [vmem:[#allocation2 + $0xf8] sm:$0xff]  ;;  %v165_v7 = vld [vmem:[#allocation2 + $0xf0] sm:$0xff] }
  0x1e   :  { %420 = vmatprep.subr.mxu0 %v64_v1  ;;  %450 = vmatprep.mubr.f32.mxu0 %v48_v4  ;;  %v60_v8 = vld [vmem:[#allocation2 + $0x50] sm:$0xff]  ;;  %v164_v9 = vld [vmem:[#allocation2 + $0xe8] sm:$0xff]  ;;  %v163_v11 = vld [vmem:[#allocation2 + $0xe0] sm:$0xff] }
  0x1f   :  { %421 = vmatpush3.msra.mxu0 %v64_v1  ;;  %453 = vmatprep.subr.mxu1 %v166_v6  ;;  %v59_v10 = vld [vmem:[#allocation2 + $0x48] sm:$0xff]  ;;  %v58_v12 = vld [vmem:[#allocation2 + $0x40] sm:$0xff]  ;;  %v162_v13 = vld [vmem:[#allocation2 + $0xd8] sm:$0xff] }
  0x20   :  { %422 = vmatprep.subr.mxu0 %v63_v2  ;;  %454 = vmatpush3.msra.mxu1 %v166_v6  ;;  %v57_v14 = vld [vmem:[#allocation2 + $0x38] sm:$0xff]  ;;  %v161_v15 = vld [vmem:[#allocation2 + $0xd0] sm:$0xff]  ;;  %v160_v17 = vld [vmem:[#allocation2 + $0xc8] sm:$0xff] }
  0x21   :  { %423 = vmatpush3.msra.mxu0 %v63_v2  ;;  %455 = vmatprep.subr.mxu1 %v165_v7  ;;  %v56_v16 = vld [vmem:[#allocation2 + $0x30] sm:$0xff]  ;;  %v55_v18 = vld [vmem:[#allocation2 + $0x28] sm:$0xff]  ;;  %v159_v19 = vld [vmem:[#allocation2 + $0xc0] sm:$0xff] }
  0x22   :  { %424 = vmatprep.subr.mxu0 %v62_v3  ;;  %456 = vmatpush3.msra.mxu1 %v165_v7  ;;  %v54_v20 = vld [vmem:[#allocation2 + $0x20] sm:$0xff]  ;;  %v158_v21 = vld [vmem:[#allocation2 + $0xb8] sm:$0xff]  ;;  %v157_v23 = vld [vmem:[#allocation2 + $0xb0] sm:$0xff] }
  0x23   :  { %425 = vmatpush3.msra.mxu0 %v62_v3  ;;  %457 = vmatprep.subr.mxu1 %v164_v9  ;;  %v53_v22 = vld [vmem:[#allocation2 + $0x18] sm:$0xff]  ;;  %v52_v24 = vld [vmem:[#allocation2 + $0x10] sm:$0xff]  ;;  %v156_v25 = vld [vmem:[#allocation2 + $0xa8] sm:$0xff] }
  0x24   :  { %426 = vmatprep.subr.mxu0 %v61_v5  ;;  %458 = vmatpush3.msra.mxu1 %v164_v9  ;;  %v51_v26 = vld [vmem:[#allocation2 + $0x8] sm:$0xff]  ;;  %v155_v27 = vld [vmem:[#allocation2 + $0xa0] sm:$0xff]  ;;  %v154_v30 = vld [vmem:[#allocation2 + $0x98] sm:$0xff] }
  0x25   :  { %427 = vmatpush3.msra.mxu0 %v61_v5  ;;  %459 = vmatprep.subr.mxu1 %v163_v11  ;;  %v50_v28 = vld [vmem:[#allocation2] sm:$0xff]  ;;  %v49_v29 = vld [vmem:[%s632_s0 + $0x8] sm:$0xff]  ;;  %v153_v31 = vld [vmem:[#allocation2 + $0x90] sm:$0xff] }
  0x26   :  { %428 = vmatprep.subr.mxu0 %v60_v8  ;;  %460 = vmatpush3.msra.mxu1 %v163_v11  ;;  %v152_v32 = vld [vmem:[#allocation2 + $0x88] sm:$0xff]  ;;  %v151_v33 = vld [vmem:[#allocation2 + $0x80] sm:$0xff]  ;;  %v267_v34 = vld [vmem:[#allocation4 + $0x78] sm:$0xff] }
  0x27   :  { %429 = vmatpush3.msra.mxu0 %v60_v8  ;;  %461 = vmatprep.subr.mxu1 %v162_v13  ;;  %v266_v35 = vld [vmem:[#allocation4 + $0x70] sm:$0xff]  ;;  %v265_v36 = vld [vmem:[#allocation4 + $0x68] sm:$0xff]  ;;  %v264_v37 = vld [vmem:[#allocation4 + $0x60] sm:$0xff] }
  0x28   :  { %430 = vmatprep.subr.mxu0 %v59_v10  ;;  %462 = vmatpush3.msra.mxu1 %v162_v13  ;;  %v263_v38 = vld [vmem:[#allocation4 + $0x58] sm:$0xff]  ;;  %v262_v39 = vld [vmem:[#allocation4 + $0x50] sm:$0xff]  ;;  %v261_v40 = vld [vmem:[#allocation4 + $0x48] sm:$0xff] }
  0x29   :  { %431 = vmatpush3.msra.mxu0 %v59_v10  ;;  %463 = vmatprep.subr.mxu1 %v161_v15  ;;  %v260_v41 = vld [vmem:[#allocation4 + $0x40] sm:$0xff]  ;;  %v259_v42 = vld [vmem:[#allocation4 + $0x38] sm:$0xff]  ;;  %v258_v43 = vld [vmem:[#allocation4 + $0x30] sm:$0xff] }
  0x2a   :  { %432 = vmatprep.subr.mxu0 %v58_v12  ;;  %464 = vmatpush3.msra.mxu1 %v161_v15  ;;  %v257_v44 = vld [vmem:[#allocation4 + $0x28] sm:$0xff]  ;;  %v256_v45 = vld [vmem:[#allocation4 + $0x20] sm:$0xff]  ;;  %v255_v53 = vld [vmem:[#allocation4 + $0x18] sm:$0xff] }
  0x2b   :  { %433 = vmatpush3.msra.mxu0 %v58_v12  ;;  %465 = vmatprep.subr.mxu1 %v160_v17  ;;  %v360_v46 = vld [vmem:[%s634_s2] ss:$0 sm:$0xff]  ;;  %v254_v54 = vld [vmem:[#allocation4 + $0x10] sm:$0xff]  ;;  %v253_v55 = vld [vmem:[#allocation4 + $0x8] sm:$0xff] }
  0x2c   :  { %434 = vmatprep.subr.mxu0 %v57_v14  ;;  %466 = vmatpush3.msra.mxu1 %v160_v17  ;;  %v252_v56 = vld [vmem:[#allocation4] sm:$0xff] }
  0x2d   :  { %435 = vmatpush3.msra.mxu0 %v57_v14  ;;  %467 = vmatprep.subr.mxu1 %v159_v19  ;;  %v362_v57 = vld [vmem:[%s634_s2 + $0x1] ss:$0 sm:$0xff]  ;;  %v363_v0 = vld [vmem:[%s636_s4] ss:$0 sm:$0xff] }
  0x2e   :  { %436 = vmatprep.subr.mxu0 %v56_v16  ;;  %468 = vmatpush3.msra.mxu1 %v159_v19 }
  0x2f   :  { %437 = vmatpush3.msra.mxu0 %v56_v16  ;;  %469 = vmatprep.subr.mxu1 %v158_v21 }
  0x30   :  { %438 = vmatprep.subr.mxu0 %v55_v18  ;;  %470 = vmatpush3.msra.mxu1 %v158_v21 }
  0x31   :  { %439 = vmatpush3.msra.mxu0 %v55_v18  ;;  %471 = vmatprep.subr.mxu1 %v157_v23 }
  0x32   :  { %440 = vmatprep.subr.mxu0 %v54_v20  ;;  %472 = vmatpush3.msra.mxu1 %v157_v23 }
  0x33   :  { %441 = vmatpush3.msra.mxu0 %v54_v20  ;;  %473 = vmatprep.subr.mxu1 %v156_v25 }
  0x34   :  { %442 = vmatprep.subr.mxu0 %v53_v22  ;;  %474 = vmatpush3.msra.mxu1 %v156_v25 }
  0x35   :  { %443 = vmatpush3.msra.mxu0 %v53_v22  ;;  %475 = vmatprep.subr.mxu1 %v155_v27 }
  0x36   :  { %444 = vmatprep.subr.mxu0 %v52_v24  ;;  %476 = vmatpush3.msra.mxu1 %v155_v27 }
  0x37   :  { %445 = vmatpush3.msra.mxu0 %v52_v24  ;;  %477 = vmatprep.subr.mxu1 %v154_v30 }
  0x38   :  { %446 = vmatprep.subr.mxu0 %v51_v26  ;;  %478 = vmatpush3.msra.mxu1 %v154_v30 }
  0x39   :  { %447 = vmatpush3.msra.mxu0 %v51_v26  ;;  %479 = vmatprep.subr.mxu1 %v153_v31 }
  0x3a   :  { %448 = vmatprep.subr.mxu0 %v50_v28  ;;  %480 = vmatpush3.msra.mxu1 %v153_v31 }
  0x3b   :  { %449 = vmatpush3.msra.mxu0 %v50_v28  ;;  %481 = vmatprep.subr.mxu1 %v152_v32 }
  0x3c   :  { %451 = vmatmul.mubr.f32.vlgmr.msra.gmra.mxu0 %v49_v29  ;;  %482 = vmatpush3.msra.mxu1 %v152_v32 }
  0x3d   :  { %483 = vmatprep.subr.mxu1 %v151_v33  ;;  %488 = vmatprep.subr.mxu0 %v267_v34 }
  0x3e   :  { %484 = vmatpush3.msra.mxu1 %v151_v33  ;;  %489 = vmatpush3.msra.mxu0 %v267_v34 }
  0x3f   :  { %490 = vmatprep.subr.mxu0 %v266_v35 }
  0x40   :  { %491 = vmatpush3.msra.mxu0 %v266_v35 }
  0x41   :  { %492 = vmatprep.subr.mxu0 %v265_v36 }
  0x42   :  { %493 = vmatpush3.msra.mxu0 %v265_v36 }
  0x43   :  { %494 = vmatprep.subr.mxu0 %v264_v37 }
  0x44   :  { %495 = vmatpush3.msra.mxu0 %v264_v37 }
  0x45   :  { %496 = vmatprep.subr.mxu0 %v263_v38 }
  0x46   :  { %497 = vmatpush3.msra.mxu0 %v263_v38 }
  0x47   :  { %498 = vmatprep.subr.mxu0 %v262_v39 }
  0x48   :  { %499 = vmatpush3.msra.mxu0 %v262_v39 }
  0x49   :  { %500 = vmatprep.subr.mxu0 %v261_v40 }
  0x4a   :  { %501 = vmatpush3.msra.mxu0 %v261_v40 }
  0x4b   :  { %502 = vmatprep.subr.mxu0 %v260_v41 }
  0x4c   :  { %503 = vmatpush3.msra.mxu0 %v260_v41 }
  0x4d   :  { %504 = vmatprep.subr.mxu0 %v259_v42 }
  0x4e   :  { %505 = vmatpush3.msra.mxu0 %v259_v42 }
  0x4f   :  { %506 = vmatprep.subr.mxu0 %v258_v43 }
  0x50   :  { %507 = vmatpush3.msra.mxu0 %v258_v43 }
  0x51   :  { %508 = vmatprep.subr.mxu0 %v257_v44 }
  0x52   :  { %509 = vmatpush3.msra.mxu0 %v257_v44 }
  0x53   :  { %510 = vmatprep.subr.mxu0 %v256_v45 }
  0x54   :  { %511 = vmatpush3.msra.mxu0 %v256_v45 }
  0x55   :  { %512 = vmatprep.subr.mxu0 %v255_v53 }
  0x56   :  { %513 = vmatpush3.msra.mxu0 %v255_v53 }
  0x57   :  { %514 = vmatprep.subr.mxu0 %v254_v54 }
  0x58   :  { %515 = vmatpush3.msra.mxu0 %v254_v54 }
  0x59   :  { %516 = vmatprep.subr.mxu0 %v253_v55 }
  0x5a   :  { %517 = vmatpush3.msra.mxu0 %v253_v55 }
  0x5b   :  { %518 = vmatprep.subr.mxu0 %v252_v56 }
  0x5c   :  { %519 = vmatpush3.msra.mxu0 %v252_v56 }
  0xfc   :  { %v452_v47 = vpop.f32.mrf.mxu0 }
  0xfd   :  { %v145_v48 = vadd.f32 %v452_v47, %v360_v46 }
  0xfe   :  { %v139_v49 = vpop.f32.mrf.mxu0 }
  0xff   :  { %v140_v50 = vadd.f32 %v360_v46, %v139_v49  ;;  %v149_v52 = vmax.f32 %v145_v48, 0.0 }
 0x101   :  { %v148_v51 = vmax.f32 %v140_v50, 0.0 }
 0x103   :  { %485 = vmatprep.mubr.f32.mxu1 %v148_v51 }
 0x104   :  { %486 = vmatmul.mubr.f32.vlgmr.msra.gmra.mxu1 %v149_v52 }
 0x1c4   :  { %v487_v58 = vpop.f32.mrf.mxu1 }
 0x1c5   :  { %v247_v59 = vadd.f32 %v487_v58, %v362_v57 }
 0x1c6   :  { %v241_v60 = vpop.f32.mrf.mxu1 }
 0x1c7   :  { %v242_v61 = vadd.f32 %v362_v57, %v241_v60  ;;  %v251_v63 = vmax.f32 %v247_v59, 0.0 }
 0x1c9   :  { %v250_v62 = vmax.f32 %v242_v61, 0.0 }
 0x1cb   :  { %520 = vmatprep.mubr.f32.mxu0 %v250_v62 }
 0x1cc   :  { %521 = vmatmul.mubr.f32.vlgmr.msra.gmra.mxu0 %v251_v63 }
 0x28c   :  { %v522_v1 = vpop.f32.mrf.mxu0 }
 0x28d   :  { %v347_v2 = vadd.f32 %v522_v1, %v363_v0 }
 0x28e   :  { %v341_v3 = vpop.f32.mrf.mxu0 }
 0x28f   :  { %v351_v4 = vmax.f32 %v347_v2, 0.0  ;;  %v342_v5 = vadd.f32 %v363_v0, %v341_v3 }
 0x291   :  { %353 = vst [vmem:[%s637_s5 + $0x8] sm:$0xff] %v351_v4  ;;  %v350_v6 = vmax.f32 %v342_v5, 0.0 }
 0x293   :  { %352 = vst [vmem:[%s637_s5] sm:$0xff] %v350_v6 }
 0x294   :  { %358 = vsyncpa [#allocation3], 1 }
 0x295   :  { %359 = vsyncpa [#allocation5], 1 }

</bundles_post_ra>
